<compile_context>
chip_gen: v6e
topology: v6e:2x2x1
jax: 0.10.0
libtpu: 0.0.40
codegen_flags: <defaults>
</compile_context>

<pallas_src>
import functools

import numpy as np
import jax
import jax.numpy as jnp
from jax import lax
from jax.experimental import pallas as pl
from jax.experimental.pallas import tpu as pltpu


def _adaptive_pool_matrix(in_size: int, out_size: int) -> jnp.ndarray:
    """Row-stochastic matrix reproducing torch.nn.AdaptiveAvgPool1d windows."""
    P = np.zeros((out_size, in_size), dtype=np.float32)
    for i in range(out_size):
        start = (i * in_size) // out_size
        end = -((-(i + 1) * in_size) // out_size)  # ceil((i+1)*in/out)
        P[i, start:end] = 1.0 / (end - start)
    return jnp.asarray(P)


def mask_gen_kernel(xcol_ref, w_ref, scale_ref, shift_ref, pqt_ref, fcw_ref,
                    fcb_ref, o_ref, *, HW, Bb):
    # --- grouped 3x3 conv as ONE im2col matmul (weights pre-expanded dense) ----
    #   (C4, 9*Cin) @ (9*Cin, Bb*HW) -> (C4, Bb*HW), f32 accumulation on MXU.
    acc = jnp.dot(w_ref[...], xcol_ref[0], preferred_element_type=jnp.float32)

    # --- BatchNorm (folded, eval stats) + ReLU, channels on sublanes -----------
    y = jnp.maximum(acc * scale_ref[...] + shift_ref[...], 0.0)   # (C4, Bb*HW)

    for b in range(Bb):                        # static, small (images of this block)
        y_b = y[:, b * HW:(b + 1) * HW]        # lane-aligned slice, (C4, HW)
        # --- AdaptiveAvgPool2d: (C4, HW) @ (HW, MMpad) --------------------------
        pooled = jnp.dot(y_b, pqt_ref[...], preferred_element_type=jnp.float32)
        # --- grouped 1x1 conv (dense block-diag) + bias: (G, C4) @ (C4, MMpad) --
        logits = jnp.dot(fcw_ref[...], pooled,
                         preferred_element_type=jnp.float32) + fcb_ref[...]
        # --- Gumbel (eval): hard threshold at 0 ---------------------------------
        o_ref[b] = (logits >= 0.0).astype(jnp.float32)


def mask_gen_forward(x, params, *, groups, mask_size, batch_blocks=2,
                     mxu_dtype=jnp.bfloat16):
    """x: (B, Cin, H, W) float32 NCHW. Returns (B, groups, M, M) float32."""
    B, Cin, H, W = x.shape
    C4 = groups * 4
    G = groups
    M = mask_size
    HW = H * W
    MM = M * M
    MMpad = max(128, ((MM + 127) // 128) * 128)     # lane-dense output slab
    cin_g = Cin // groups

    # grouped conv3x3 weight (C4, Cin/g, 3, 3) -> dense block-diag (C4, 9*Cin).
    conv_w = params["conv_w"].astype(jnp.float32)
    w_dense = jnp.zeros((3, 3, Cin, C4), jnp.float32)
    for g in range(groups):
        wg = conv_w[g * 4:(g + 1) * 4]                        # (4, cin_g, 3, 3)
        w_dense = w_dense.at[:, :, g * cin_g:(g + 1) * cin_g,
                             g * 4:(g + 1) * 4].set(jnp.transpose(wg, (2, 3, 1, 0)))
    wT = w_dense.reshape(9 * Cin, C4).T.astype(mxu_dtype)     # (C4, 9*Cin)

    # BatchNorm (eval) folded into scale/shift, channels on sublanes -> (C4, 1).
    eps = 1e-5
    inv_std = params["bn_gamma"] / jnp.sqrt(params["bn_var"] + eps)
    scale = inv_std.reshape(C4, 1).astype(jnp.float32)
    shift = (params["bn_beta"] - params["bn_mean"] * inv_std).reshape(C4, 1).astype(jnp.float32)

    # Pooling matrix, transposed for spatial-on-lanes layout and lane-padded.
    P = _adaptive_pool_matrix(H, M)
    Q = _adaptive_pool_matrix(W, M)
    PQT = jnp.kron(P, Q).T                                    # (HW, MM)
    PQT = jnp.pad(PQT, ((0, 0), (0, MMpad - MM))).astype(jnp.float32)

    # grouped 1x1 conv weight (G, 4, 1, 1) -> dense (G, C4); bias (G, 1).
    fc_w = params["fc_w"].astype(jnp.float32)
    fcwT = jnp.zeros((G, C4), jnp.float32)
    for g in range(G):
        fcwT = fcwT.at[g, g * 4:(g + 1) * 4].set(fc_w[g, :, 0, 0])
    fcb = params["fc_b"].reshape(G, 1).astype(jnp.float32)

    # im2col built in the wrapper (cheap XLA-side gather): (B, 9*Cin, HW).
    x_pad = jnp.pad(x.astype(jnp.float32), ((0, 0), (0, 0), (1, 1), (1, 1)))
    taps = [x_pad[:, :, dh:dh + H, dw:dw + W].reshape(B, Cin, HW)
            for dh in range(3) for dw in range(3)]
    x_col = jnp.concatenate(taps, axis=1)                     # (B, 9*Cin, HW)

    # Fold the batch into <= batch_blocks fat grid steps; images stacked on lanes.
    num_blocks = max(1, min(batch_blocks, B))
    Bb = -(-B // num_blocks)                                  # ceil
    Bpad = num_blocks * Bb
    if Bpad != B:
        x_col = jnp.pad(x_col, ((0, Bpad - B), (0, 0), (0, 0)))
    x_col = (x_col.reshape(num_blocks, Bb, 9 * Cin, HW)
             .transpose(0, 2, 1, 3)
             .reshape(num_blocks, 9 * Cin, Bb * HW)
             .astype(mxu_dtype))

    kernel = functools.partial(mask_gen_kernel, HW=HW, Bb=Bb)
    out = pl.pallas_call(
        kernel,
        out_shape=jax.ShapeDtypeStruct((Bpad, G, MMpad), jnp.float32),
        grid=(num_blocks,),
        in_specs=[
            pl.BlockSpec((1, 9 * Cin, Bb * HW), lambda i: (i, 0, 0)),
            pl.BlockSpec((C4, 9 * Cin), lambda i: (0, 0)),
            pl.BlockSpec((C4, 1), lambda i: (0, 0)),
            pl.BlockSpec((C4, 1), lambda i: (0, 0)),
            pl.BlockSpec((HW, MMpad), lambda i: (0, 0)),
            pl.BlockSpec((G, C4), lambda i: (0, 0)),
            pl.BlockSpec((G, 1), lambda i: (0, 0)),
        ],
        out_specs=pl.BlockSpec((Bb, G, MMpad), lambda i: (i, 0, 0)),
        compiler_params=pltpu.CompilerParams(dimension_semantics=("parallel",)),
    )(x_col, wT, scale, shift, PQT, fcwT, fcb)

    # (Bpad, G, MMpad) -> (B, G, M, M)  (PyTorch output convention)
    return out[:B, :, :MM].reshape(B, G, M, M)


def mask_gen_reference(x, params, *, groups, mask_size):
    """Pure-JAX reference (eval mode). Returns (gates, pre-threshold logits)."""
    xf = x.astype(jnp.float32)
    y = lax.conv_general_dilated(
        xf, params["conv_w"].astype(jnp.float32), (1, 1), ((1, 1), (1, 1)),
        dimension_numbers=("NCHW", "OIHW", "NCHW"), feature_group_count=groups)
    inv_std = params["bn_gamma"] / jnp.sqrt(params["bn_var"] + 1e-5)
    y = y * inv_std[None, :, None, None] + \
        (params["bn_beta"] - params["bn_mean"] * inv_std)[None, :, None, None]
    y = jnp.maximum(y, 0.0)
    H, W = x.shape[2], x.shape[3]
    P = _adaptive_pool_matrix(H, mask_size)
    Q = _adaptive_pool_matrix(W, mask_size)
    y = jnp.einsum("ih,bchw->bciw", P, y)
    y = jnp.einsum("jw,bciw->bcij", Q, y)
    z = lax.conv_general_dilated(
        y, params["fc_w"].astype(jnp.float32), (1, 1), ((0, 0), (0, 0)),
        dimension_numbers=("NCHW", "OIHW", "NCHW"), feature_group_count=groups)
    z = z + params["fc_b"][None, :, None, None]
    return (z >= 0.0).astype(jnp.float32), z


if __name__ == "__main__":
    B, groups, inplanes, H, W, mask_size = 2, 2, 8, 16, 16, 7
    C4 = groups * 4

    key = jax.random.PRNGKey(0)
    k = jax.random.split(key, 8)
    x = jax.random.normal(k[0], (B, inplanes, H, W), jnp.float32)

    params = {
        # conv3x3_gs[0]: Conv2d(inplanes, groups*4, 3, groups=groups, bias=False)
        "conv_w": 0.2 * jax.random.normal(k[1], (C4, inplanes // groups, 3, 3), jnp.float32),
        # conv3x3_gs[1]: BatchNorm2d(groups*4) — eval-mode running stats
        "bn_gamma": 1.0 + 0.1 * jax.random.normal(k[2], (C4,), jnp.float32),
        "bn_beta": 0.1 * jax.random.normal(k[3], (C4,), jnp.float32),
        "bn_mean": 0.1 * jax.random.normal(k[4], (C4,), jnp.float32),
        "bn_var": jnp.abs(jax.random.normal(k[5], (C4,), jnp.float32)) + 0.5,
        # fc_gs: Conv2d(groups*4, groups, 1, groups=groups, bias=True), bias := 10.0
        "fc_w": 0.2 * jax.random.normal(k[6], (groups, 4, 1, 1), jnp.float32),
        "fc_b": jnp.full((groups,), 10.0, jnp.float32),
    }

    gates = mask_gen_forward(x, params, groups=groups, mask_size=mask_size)
    gates = jax.block_until_ready(gates)

    ref_gates, ref_logits = mask_gen_reference(x, params, groups=groups, mask_size=mask_size)
    assert gates.shape == (B, groups, mask_size, mask_size), gates.shape
    # The module output is a hard threshold with bias 10.0; verify the logit
    # margin dwarfs bf16-matmul error so the thresholded masks must agree exactly.
    assert float(jnp.min(jnp.abs(ref_logits))) > 1e-2
    np.testing.assert_array_equal(np.asarray(gates), np.asarray(ref_gates))

    print("KERNEL_OK")
</pallas_src>

<mosaic_0001>
module attributes {stable_mosaic.version = 11 : i64} {
  func.func @mask_gen_kernel(%arg0: i32, %arg1: memref<1x72x256xbf16, #tpu.memory_space<vmem>>, %arg2: memref<8x72xbf16, #tpu.memory_space<vmem>>, %arg3: memref<8x1xf32, #tpu.memory_space<vmem>>, %arg4: memref<8x1xf32, #tpu.memory_space<vmem>>, %arg5: memref<256x128xf32, #tpu.memory_space<vmem>>, %arg6: memref<2x8xf32, #tpu.memory_space<vmem>>, %arg7: memref<2x1xf32, #tpu.memory_space<vmem>>, %arg8: memref<1x2x128xf32, #tpu.memory_space<vmem>>) attributes {dimension_semantics = [#tpu.dimension_semantics<parallel>], iteration_bounds = array<i64: 2>, scalar_prefetch = 0 : i64, scratch_operands = 0 : i64, tpu.core_type = #tpu.core_type<tc>, window_params = [{transform_indices = @transform_0, window_bounds = array<i64: 1, 72, 256>}, {pipeline_mode = #tpu.pipeline_mode<synchronous>, transform_indices = @transform_1, window_bounds = array<i64: 8, 72>}, {pipeline_mode = #tpu.pipeline_mode<synchronous>, transform_indices = @transform_2, window_bounds = array<i64: 8, 1>}, {pipeline_mode = #tpu.pipeline_mode<synchronous>, transform_indices = @transform_3, window_bounds = array<i64: 8, 1>}, {pipeline_mode = #tpu.pipeline_mode<synchronous>, transform_indices = @transform_4, window_bounds = array<i64: 256, 128>}, {pipeline_mode = #tpu.pipeline_mode<synchronous>, transform_indices = @transform_5, window_bounds = array<i64: 2, 8>}, {pipeline_mode = #tpu.pipeline_mode<synchronous>, transform_indices = @transform_6, window_bounds = array<i64: 2, 1>}, {transform_indices = @transform_7, window_bounds = array<i64: 1, 2, 128>}]} {
    %c0 = arith.constant 0 : index
    %c0_0 = arith.constant 0 : index
    %0 = vector.load %arg2[%c0, %c0_0] : memref<8x72xbf16, #tpu.memory_space<vmem>>, vector<8x72xbf16>
    %c0_1 = arith.constant 0 : index
    %c0_2 = arith.constant 0 : index
    %c0_3 = arith.constant 0 : index
    %1 = vector.load %arg1[%c0_1, %c0_2, %c0_3] : memref<1x72x256xbf16, #tpu.memory_space<vmem>>, vector<1x72x256xbf16>
    %2 = vector.shape_cast %1 : vector<1x72x256xbf16> to vector<72x256xbf16>
    %cst = arith.constant dense<0.000000e+00> : vector<8x256xf32>
    %3 = tpu.matmul %0, %2, %cst {dimension_numbers = #tpu.dot_dimension_numbers<[1], [0], [0], [1], [0, 0, 1, 1], [], []>} : vector<8x72xbf16>, vector<72x256xbf16>, vector<8x256xf32> -> vector<8x256xf32>
    %c0_4 = arith.constant 0 : index
    %c0_5 = arith.constant 0 : index
    %4 = vector.load %arg3[%c0_4, %c0_5] : memref<8x1xf32, #tpu.memory_space<vmem>>, vector<8x1xf32>
    %5 = vector.broadcast %4 : vector<8x1xf32> to vector<8x256xf32>
    %6 = arith.mulf %3, %5 : vector<8x256xf32>
    %c0_6 = arith.constant 0 : index
    %c0_7 = arith.constant 0 : index
    %7 = vector.load %arg4[%c0_6, %c0_7] : memref<8x1xf32, #tpu.memory_space<vmem>>, vector<8x1xf32>
    %8 = vector.broadcast %7 : vector<8x1xf32> to vector<8x256xf32>
    %9 = arith.addf %6, %8 : vector<8x256xf32>
    %cst_8 = arith.constant 0.000000e+00 : f32
    %10 = vector.broadcast %cst_8 : f32 to vector<8x256xf32>
    %11 = arith.maximumf %9, %10 : vector<8x256xf32>
    %c0_9 = arith.constant 0 : index
    %c0_10 = arith.constant 0 : index
    %12 = vector.load %arg5[%c0_9, %c0_10] : memref<256x128xf32, #tpu.memory_space<vmem>>, vector<256x128xf32>
    %cst_11 = arith.constant dense<0.000000e+00> : vector<8x128xf32>
    %13 = tpu.matmul %11, %12, %cst_11 {dimension_numbers = #tpu.dot_dimension_numbers<[1], [0], [0], [1], [0, 0, 1, 1], [], []>} : vector<8x256xf32>, vector<256x128xf32>, vector<8x128xf32> -> vector<8x128xf32>
    %c0_12 = arith.constant 0 : index
    %c0_13 = arith.constant 0 : index
    %14 = vector.load %arg6[%c0_12, %c0_13] : memref<2x8xf32, #tpu.memory_space<vmem>>, vector<2x8xf32>
    %cst_14 = arith.constant dense<0.000000e+00> : vector<2x128xf32>
    %15 = tpu.matmul %14, %13, %cst_14 {dimension_numbers = #tpu.dot_dimension_numbers<[1], [0], [0], [1], [0, 0, 1, 1], [], []>} : vector<2x8xf32>, vector<8x128xf32>, vector<2x128xf32> -> vector<2x128xf32>
    %c0_15 = arith.constant 0 : index
    %c0_16 = arith.constant 0 : index
    %16 = vector.load %arg7[%c0_15, %c0_16] : memref<2x1xf32, #tpu.memory_space<vmem>>, vector<2x1xf32>
    %17 = vector.broadcast %16 : vector<2x1xf32> to vector<2x128xf32>
    %18 = arith.addf %15, %17 : vector<2x128xf32>
    %cst_17 = arith.constant 0.000000e+00 : f32
    %19 = vector.broadcast %cst_17 : f32 to vector<2x128xf32>
    %20 = arith.cmpf oge, %18, %19 : vector<2x128xf32>
    %21 = arith.extui %20 : vector<2x128xi1> to vector<2x128xi32>
    %22 = arith.sitofp %21 : vector<2x128xi32> to vector<2x128xf32>
    %c0_18 = arith.constant 0 : index
    %c0_19 = arith.constant 0 : index
    %c0_20 = arith.constant 0 : index
    %23 = vector.load %arg8[%c0_18, %c0_19, %c0_20] : memref<1x2x128xf32, #tpu.memory_space<vmem>>, vector<1x2x128xf32>
    %24 = vector.shape_cast %23 : vector<1x2x128xf32> to vector<2x128xf32>
    %25 = vector.shape_cast %22 : vector<2x128xf32> to vector<1x2x128xf32>
    tpu.vector_store %arg8[%c0_18, %c0_19, %c0_20], %25 {strides = array<i32>} : memref<1x2x128xf32, #tpu.memory_space<vmem>>, vector<1x2x128xf32>,
    return
  }
  func.func @transform_0(%arg0: i32) -> (i32, i32, i32) {
    %c0_i32 = arith.constant 0 : i32
    %c0_i32_0 = arith.constant 0 : i32
    %c0_i32_1 = arith.constant 0 : i32
    return %arg0, %c0_i32, %c0_i32_0 : i32, i32, i32
  }
  func.func @transform_1(%arg0: i32) -> (i32, i32) {
    %c0_i32 = arith.constant 0 : i32
    %c0_i32_0 = arith.constant 0 : i32
    %c0_i32_1 = arith.constant 0 : i32
    return %c0_i32, %c0_i32_0 : i32, i32
  }
  func.func @transform_2(%arg0: i32) -> (i32, i32) {
    %c0_i32 = arith.constant 0 : i32
    %c0_i32_0 = arith.constant 0 : i32
    %c0_i32_1 = arith.constant 0 : i32
    return %c0_i32, %c0_i32_0 : i32, i32
  }
  func.func @transform_3(%arg0: i32) -> (i32, i32) {
    %c0_i32 = arith.constant 0 : i32
    %c0_i32_0 = arith.constant 0 : i32
    %c0_i32_1 = arith.constant 0 : i32
    return %c0_i32, %c0_i32_0 : i32, i32
  }
  func.func @transform_4(%arg0: i32) -> (i32, i32) {
    %c0_i32 = arith.constant 0 : i32
    %c0_i32_0 = arith.constant 0 : i32
    %c0_i32_1 = arith.constant 0 : i32
    return %c0_i32, %c0_i32_0 : i32, i32
  }
  func.func @transform_5(%arg0: i32) -> (i32, i32) {
    %c0_i32 = arith.constant 0 : i32
    %c0_i32_0 = arith.constant 0 : i32
    %c0_i32_1 = arith.constant 0 : i32
    return %c0_i32, %c0_i32_0 : i32, i32
  }
  func.func @transform_6(%arg0: i32) -> (i32, i32) {
    %c0_i32 = arith.constant 0 : i32
    %c0_i32_0 = arith.constant 0 : i32
    %c0_i32_1 = arith.constant 0 : i32
    return %c0_i32, %c0_i32_0 : i32, i32
  }
  func.func @transform_7(%arg0: i32) -> (i32, i32, i32) {
    %c0_i32 = arith.constant 0 : i32
    %c0_i32_0 = arith.constant 0 : i32
    %c0_i32_1 = arith.constant 0 : i32
    return %arg0, %c0_i32, %c0_i32_0 : i32, i32, i32
  }
}

</mosaic_0001>

<bundles_post_ra>
// kernel: tpu_custom_call.1
= control target key start
LH: loop header
LB: loop body
LE: loop exit
PB: predicated region body
PF: predicated region fallthrough
CT: control target
= control target key end

     0   :  { %s1242_s0 = inlined_call_operand.hbm [shape: bf16[2,72,256], index: 0, kind: input, shape index: {}]   ;;  %s1243_s1 = inlined_call_operand.vmem [shape: bf16[8,72], index: 1, kind: input, shape index: {}]   ;;  %s1244_s2 = inlined_call_operand.vmem [shape: f32[8,1], index: 2, kind: input, shape index: {}]   ;;  %s1245_s3 = inlined_call_operand.vmem [shape: f32[8,1], index: 3, kind: input, shape index: {}]   ;;  %s1246_s4 = inlined_call_operand.hbm [shape: f32[256,128], index: 4, kind: input, shape index: {}]   ;;  %s1247_s5 = inlined_call_operand.vmem [shape: f32[2,8], index: 5, kind: input, shape index: {}]   ;;  %s1248_s6 = inlined_call_operand.vmem [shape: f32[2,1], index: 6, kind: input, shape index: {}]   ;;  %s1249_s7 = inlined_call_operand.hbm [shape: f32[2,2,128], index: 7, kind: output, shape index: {}]  }
   0x1   :  { %1256 = sst [smem:[#allocation11_spill]] %s1246_s4 }
   0x2   :  { %12 = vsyncpa [#allocation3], 0 }
   0x3   :  { %14 = vsyncpa [#allocation3 + $0x1], 0 }
   0x4   :  { %15 = vsyncpa [#allocation6], 0 }
   0x5   :  { %16 = vsyncpa [#allocation4], 0 }
   0x6   :  { %18 = vsyncpa [#allocation4 + $0x1], 0  ;;  %s1040_s24 = smov 0   ;;  %s1042_s25 = smov 0  }
   0x7   :  { %s1044_s26 = smov 0   ;;  %s1046_s27 = smov 0  }
   0x8 LB: > { %s1061_s28 = sadd.s32 4294967295, %s990_s27   ;;  %s719_s29 = sadd.s32 4294967294, %s990_s27   ;;  %s990_s27 = sphi %s1046_s27, %s1277_s27   ;;  %s986_s26 = sphi %s1044_s26, %s1276_s26   ;;  %s982_s25 = sphi %s1042_s25, %s1275_s25   ;;  %s978_s24 = sphi %s1040_s24, %s1274_s24  }
   0x9   : > { %p44_p0 = scmp.ne.s32.totalorder %s982_s25, %s978_s24  ;;  %p1252_p1 = scmp.eq.s32.totalorder %s1061_s28, 0 }
   0xa   : > { %p200_p3 = scmp.eq.s32.totalorder %s719_s29, 1  ;;  %p720_p5 = scmp.ge.s32.totalorder %s990_s27, 1 }
   0xb   : > { %p1070_p4 = por %p1252_p1, %p44_p0  ;;  %p207_p7 = scmp.lt.s32.totalorder %s990_s27, 3 }
   0xc   : > { %p1075_p6 = por %p200_p3, %p44_p0  ;;  %s992_s10 = smov [#allocation5]  }
   0xd   : > { %s1257_s30 = scalar_select %p1070_p4, 1, 0 }
   0xe   : > { %s1258_s8 = scalar_select %p1075_p6, 1, 0 }
   0xf   : > { %p1080_p8 = pnand %p720_p5, %p207_p7  ;;  %s228_s11 = sshll.u32 %s992_s10, 4  ;;  %s229_s11 = int_to_ptr.vmem [resolvable:$true] %s228_s11 }
  0x10   : > { %s1094_s13 = sadd.s32 1, %s990_s27   ;;  %s31_s14 = sadd.s32 1, %s986_s26 }
  0x11   : > { %s1259_s9 = scalar_select %p1080_p8, 1, 0 }
  0x12   : > { %p798_p9 = pneg %p1080_p8  ;;  %s28_s15 = ssub.s32 %s990_s27, %s1094_s13 }
  0x13   : > { %s879_s16 = scalar_lea.vmem %s229_s11, 4096  ;;  %p887_p5 = scmp.lt.s32.totalorder %s229_s11, %s229_s11 }
  0x14   : > { %p1089_p11 = pnand %p798_p9, %p1252_p1  ;;  %p880_p13 = scmp.ne.s32.totalorder %s229_s11, %s879_s16 }
  0x15   : > { %p888_p7 = scmp.lt.s32.totalorder %s879_s16, %s879_s16 }
  0x16   : > { %p870_p12 = pneg %p1089_p11 }
  0x17   : > { %p889_p10 = por %p888_p7, %p887_p5 }
  0x18   : > { %p882_p0 = pnand %p880_p13, %p870_p12 }
  0x1a   : > { %p883_p3 = pneg %p882_p0 }
  0x1c   : > { %p890_p2 = pnand %p889_p10, %p883_p3 }
  0x1e   : > { %893 = shalt.err (!%p890_p2)
}
  0x1f   : > { %s1250_s17 = smov 128   ;;  %s1251_s18 = smov 8  }
  0x20   : > { %s1261_s4 = sld [smem:[#allocation11_spill]]  ;;  %p29_p2 = scmp.eq.s32.totalorder %s28_s15, 0 }
  0x21   : > { %p38_p9 = scmp.ne.s32.totalorder %s986_s26, %s982_s25  ;;  %p39_p10 = scmp.eq.s32.totalorder %s990_s27, 0 }
  0x22   : > { %p811_p12 = scmp.lt.s32.totalorder %s990_s27, 2  ;;  %p1262_p0 = scmp.eq.s32.totalorder %s1061_s28, 1 }
  0x23   : > { %s1114_s21 = scalar_select %p29_p2, %s986_s26, %s31_s14  }
  0x24   : > { %p40_p13 = por %p39_p10, %p38_p9  ;;  %p1118_p3 = por %p1262_p0, %p38_p9 }
  0x25   : > { %s248_s23 = sand.u32 1, %s986_s26   ;;  %s788_s29 = smul.u32 1152, %s990_s27 }
  0x26   : > { %801 = dma.hbm_to_vmem [thread:$0]  (!%p1089_p11), %s1261_s4, 4096, %s229_s11, [#allocation6], %s1250_s17, %s1250_s17, %s1251_s18  }
  0x27   : > { %s1263_s22 = scalar_select %p1118_p3, 1, 0 }
  0x28   : > { %s787_s10 = smul.u32 72, %s248_s23  ;;  %p1124_p5 = pnand %p811_p12, %p40_p13 }
  0x29   : > { %s1131_s16 = scalar_lea.hbm %s1242_s0, %s788_s29  ;;  %s1135_s20 = scalar_lea.sflag [#allocation3], %s248_s23 }
  0x2a   : > { %s252_s14 = scalar_lea.vmem [#allocation2], %s787_s10  ;;  %s894_s17 = scalar_lea.hbm %s1131_s16, 1152 }
  0x2b   : > { %s259_s19 = sshll.u32 %s252_s14, 4  ;;  %p895_p11 = scmp.ne.s32.totalorder %s1131_s16, %s894_s17  ;;  %s1133_s19 = int_to_ptr.vmem [resolvable:$true] %s259_s19 }
  0x2c   : > { %p896_p7 = pneg %p1124_p5  ;;  %s899_s29 = scalar_lea.hbm %s1242_s0, 2304 }
  0x2d   : > { %p900_p10 = scmp.lt.s32.totalorder %s1131_s16, %s1242_s0  ;;  %p901_p12 = scmp.lt.s32.totalorder %s899_s29, %s894_s17 }
  0x2e   : > { %p897_p2 = pnand %p896_p7, %p895_p11 }
  0x2f   : > { %p902_p13 = por %p901_p12, %p900_p10 }
  0x30   : > { %p898_p9 = pneg %p897_p2 }
  0x32   : > { %p903_p0 = pnand %p902_p13, %p898_p9 }
  0x34   : > { %906 = shalt.err (!%p903_p0)
}
  0x35   : > { %s907_s23 = scalar_lea.vmem %s1133_s19, 1152  ;;  %s995_s10 = smov [#allocation2]  }
  0x36   : > { %p908_p1 = scmp.ne.s32.totalorder %s1133_s19, %s907_s23  ;;  %s912_s14 = sshll.u32 %s995_s10, 4  ;;  %s913_s14 = int_to_ptr.vmem [resolvable:$false] %s912_s14 }
  0x37   : > { %s914_s18 = scalar_lea.vmem %s913_s14, 2304  ;;  %p915_p2 = scmp.lt.s32.totalorder %s1133_s19, %s913_s14 }
  0x38   : > { %p910_p6 = pnand %p908_p1, %p896_p7  ;;  %p916_p3 = scmp.lt.s32.totalorder %s914_s18, %s907_s23 }
  0x3a   : > { %p911_p11 = pneg %p910_p6  ;;  %p917_p4 = por %p916_p3, %p915_p2 }
  0x3c   : > { %p918_p8 = pnand %p917_p4, %p911_p11 }
  0x3e   : > { %921 = shalt.err (!%p918_p8)
}
  0x3f   : > { %s1265_s4 = smov 8   ;;  %s1266_s17 = smov 128  }
  0x40   : > { %805 = dma.hbm_to_vmem [thread:$0]  (!%p1124_p5), %s1131_s16, 1152, %s1133_s19, %s1135_s20, %s1266_s17, %s1266_s17, %s1265_s4  }
  0x41   : > { %p1267_p1 = scmp.ne.s32.totalorder %s1259_s9, 0 }
  0x42   : > { %s1162_s11 = sand.u32 (!%p1267_p1), 1, %s982_s25   ;;  %p1268_p4 = scmp.ne.s32.totalorder (!%p1267_p1), %s1257_s30, 0 }
  0x43   : > { %271 = sbr.rel (%p1267_p1) target bundleno = 709 (0x2c5), region = 48  ;;  %s274_s15 = scalar_lea.sflag (!%p1267_p1), [#allocation3], %s1162_s11 }
  0x44   : > { %s789_s29 = smul.u32 (!%p1267_p1), 72, %s1162_s11 }
  0x46   : > { %s1166_s23 = scalar_lea.vmem (!%p1267_p1), [#allocation2], %s789_s29 }
  0x48   : > { %965 = dma.done.wait (%p1268_p4), %s274_s15, 1152  }
  0x49   : > { %967 = vsyncadd (%p1268_p4), %s274_s15, 4294966144  ;;  %p1269_p6 = scmp.eq.s32.totalorder %s1061_s28, 0 }
  0x4b   : > { %969 = dma.done.wait (%p1269_p6), [#allocation6], 4096   ;;  %p1270_p8 = pmov %p1269_p6 }
  0x4c   : > { %v996_v0 = vmov 0   ;;  %v322_v1 = vld [vmem:[%s1166_s23 + $0x40] sm:$0xff]  ;;  %vm372_vm0 = vcmask 1043456   ;;  %v856_v4 = vld [vmem:[%s1166_s23 + $0x34] ss:$8 sps:$4 sm:$0xff]   ;;  %vm368_vm1 = vcmask 588800  }
  0x4d   : > { %971 = vsyncadd (%p1270_p8), [#allocation6], 4294963200  ;;  %411 = vmatprep.mubr.bf16.mxu0 %v996_v0  ;;  %852 = vset.pattern.permute.xlu0 %v996_v0  ;;  %v736_v2 = vcombine.high %v322_v1, %v322_v1  ;;  %v735_v3 = vcombine.low %v322_v1, %v322_v1  ;;  %v858_v6 = vld [vmem:[%s1166_s23 + $0x30] ss:$8 sps:$4 sm:$0xff]   ;;  %v859_v7 = vld [vmem:[%s1166_s23 + $0x24] ss:$8 sps:$4 sm:$0xff]  }
  0x4e   : > { %853 = vset.pattern.permute.xlu1 %v996_v0  ;;  %v420_v8 = vld [vmem:[%s1244_s2] sm:$0xff]  ;;  %v469_v9 = vld [vmem:[#allocation5 + $0xf8] sm:$0xff]  ;;  %v467_v15 = vld [vmem:[#allocation5 + $0xe8] sm:$0xff]  ;;  %v997_v60 = vmov 0.0   ;;  %vm998_vm2 = vmmov 0   ;;  %vm547_vm3 = vcmask 64512  }
  0x4f   : > { %737 = vmatprep.subr.msk.bf16.mxu0 %vm372_vm0, %v736_v2  ;;  %v374_v5 = vsel %vm372_vm0, %v735_v3, 0  ;;  %423 = vperm.xlu0 %852, %v420_v8   ;;  %v453_v10 = vld [vmem:[#allocation5 + $0x78] sm:$0xff]  ;;  %v468_v11 = vld [vmem:[#allocation5 + $0xf0] sm:$0xff]  ;;  %v451_v17 = vld [vmem:[#allocation5 + $0x68] sm:$0xff]  ;;  %s726_s17 = sshll.u32 %s1162_s11, 1  ;;  %s742_s29 = sshll.u32 %s1061_s28, 5 }
  0x50   : > { %386 = vmatpush1.bf16.msra.mxu0 %v374_v5  ;;  %745 = vmatprep.subr.mxu1 %v469_v9  ;;  %v452_v12 = vld [vmem:[#allocation5 + $0x70] sm:$0xff]  ;;  %v466_v18 = vld [vmem:[#allocation5 + $0xe0] sm:$0xff]  ;;  %v465_v21 = vld [vmem:[#allocation5 + $0xd8] sm:$0xff]  ;;  %s311_s15 = scalar_lea.vmem [#allocation7], %s726_s17  ;;  %s1205_s12 = scalar_lea.hbm %s1249_s7, %s742_s29 }
  0x51   : > { %387 = vmatprep.subr.bf16.mxu0 %v856_v4  ;;  %v861_v13 = vld [vmem:[%s1166_s23 + $0x20] ss:$8 sps:$4 sm:$0xff]   ;;  %746 = vmatpush3.msra.mxu1 %v453_v10  ;;  %v862_v16 = vld [vmem:[%s1166_s23 + $0x14] ss:$8 sps:$4 sm:$0xff]   ;;  %v864_v20 = vld [vmem:[%s1166_s23 + $0x10] ss:$8 sps:$4 sm:$0xff]  }
  0x52   : > { %v428_v14 = vld [vmem:[%s1245_s3] sm:$0xff]  ;;  %747 = vmatprep.subr.mxu1 %v468_v11  ;;  %v450_v19 = vld [vmem:[#allocation5 + $0x60] sm:$0xff]  ;;  %v449_v23 = vld [vmem:[#allocation5 + $0x58] sm:$0xff]  ;;  %s626_s16 = scalar_lea.sflag [#allocation4], %s1162_s11  ;;  %p1271_p5 = scmp.ne.s32.totalorder %s1263_s22, 0 }
  0x53   : > { %748 = vmatpush3.msra.mxu1 %v452_v12  ;;  %431 = vperm.xlu0 %852, %v428_v14   ;;  %v865_v22 = vld [vmem:[%s1166_s23 + $0x4] ss:$8 sps:$4 sm:$0xff]   ;;  %v867_v26 = vld [vmem:[%s1166_s23] ss:$8 sps:$4 sm:$0xff]   ;;  %v463_v27 = vld [vmem:[#allocation5 + $0xc8] sm:$0xff]  ;;  %s639_s23 = sshll.u32 %s311_s15, 4  ;;  %s640_s23 = int_to_ptr.vmem [resolvable:$true] %s639_s23 }
  0x54   : > { %388 = vmatpush1.bf16.msra.mxu0 %v858_v6  ;;  %749 = vmatprep.subr.mxu1 %v467_v15  ;;  %v464_v24 = vld [vmem:[#allocation5 + $0xd0] sm:$0xff]  ;;  %v447_v28 = vld [vmem:[#allocation5 + $0x48] sm:$0xff]  ;;  %v462_v29 = vld [vmem:[#allocation5 + $0xc0] sm:$0xff]  ;;  %s922_s19 = scalar_lea.vmem %s640_s23, 32  ;;  %s999_s28 = smov [#allocation7]  }
  0x55   : > { %389 = vmatprep.subr.bf16.mxu0 %v859_v7  ;;  %750 = vmatpush3.msra.mxu1 %v451_v17  ;;  %v448_v25 = vld [vmem:[#allocation5 + $0x50] sm:$0xff]  ;;  %v446_v30 = vld [vmem:[#allocation5 + $0x40] sm:$0xff]  ;;  %v461_v32 = vld [vmem:[#allocation5 + $0xb8] sm:$0xff]  ;;  %p923_p3 = scmp.ne.s32.totalorder %s640_s23, %s922_s19  ;;  %s926_s20 = sshll.u32 %s999_s28, 4  ;;  %s927_s20 = int_to_ptr.vmem [resolvable:$false] %s926_s20 }
  0x56   : > { %751 = vmatprep.subr.mxu1 %v466_v18  ;;  %v313_v31 = vld [vmem:[%s1243_s1] sm:$0xf]  ;;  %v445_v33 = vld [vmem:[#allocation5 + $0x38] sm:$0xff]  ;;  %v459_v36 = vld [vmem:[#allocation5 + $0xa8] sm:$0xff]  ;;  %s928_s10 = scalar_lea.vmem %s927_s20, 64  ;;  %p929_p10 = scmp.lt.s32.totalorder %s640_s23, %s927_s20 }
  0x57   : > { %752 = vmatpush3.msra.mxu1 %v450_v19  ;;  %v460_v34 = vld [vmem:[#allocation5 + $0xb0] sm:$0xff]  ;;  %v443_v37 = vld [vmem:[#allocation5 + $0x28] sm:$0xff]  ;;  %v458_v38 = vld [vmem:[#allocation5 + $0xa0] sm:$0xff]  ;;  %p924_p7 = pnand %p923_p3, %p1271_p5  ;;  %p930_p12 = scmp.lt.s32.totalorder %s928_s10, %s922_s19 }
  0x58   : > { %390 = vmatpush1.bf16.msra.mxu0 %v861_v13  ;;  %753 = vmatprep.subr.mxu1 %v465_v21  ;;  %v444_v35 = vld [vmem:[#allocation5 + $0x30] sm:$0xff]  ;;  %v442_v39 = vld [vmem:[#allocation5 + $0x20] sm:$0xff]  ;;  %v457_v40 = vld [vmem:[#allocation5 + $0x98] sm:$0xff] }
  0x59   : > { %391 = vmatprep.subr.bf16.mxu0 %v862_v16  ;;  %754 = vmatpush3.msra.mxu1 %v449_v23  ;;  %v441_v41 = vld [vmem:[#allocation5 + $0x18] sm:$0xff]  ;;  %v456_v42 = vld [vmem:[#allocation5 + $0x90] sm:$0xff]  ;;  %v455_v44 = vld [vmem:[#allocation5 + $0x88] sm:$0xff]  ;;  %p925_p9 = pneg %p924_p7  ;;  %p931_p13 = por %p930_p12, %p929_p10 }
  0x5a   : > { %755 = vmatprep.subr.mxu1 %v464_v24  ;;  %v440_v43 = vld [vmem:[#allocation5 + $0x10] sm:$0xff]  ;;  %v439_v45 = vld [vmem:[#allocation5 + $0x8] sm:$0xff]  ;;  %v454_v46 = vld [vmem:[#allocation5 + $0x80] sm:$0xff] }
  0x5b   : > { %756 = vmatpush3.msra.mxu1 %v448_v25  ;;  %v438_v47 = vld [vmem:[#allocation5] sm:$0xff]  ;;  %v541_v61 = vld [vmem:[%s1248_s6] sm:$0x3]  ;;  %p932_p0 = pnand %p931_p13, %p925_p9 }
  0x5c   : > { %392 = vmatpush1.bf16.msra.mxu0 %v864_v20  ;;  %757 = vmatprep.subr.mxu1 %v463_v27  ;;  %v540_v1 = vld [vmem:[%s1247_s5] sm:$0x3] }
  0x5d   : > { %393 = vmatprep.subr.bf16.mxu0 %v865_v22  ;;  %758 = vmatpush3.msra.mxu1 %v447_v28 }
  0x5e   : > { %759 = vmatprep.subr.mxu1 %v462_v29  ;;  %544 = vperm.xlu1 %853, %v541_v61  }
  0x5f   : > { %760 = vmatpush3.msra.mxu1 %v446_v30 }
  0x60   : > { %394 = vmatpush1.bf16.msra.mxu0 %v867_v26  ;;  %761 = vmatprep.subr.mxu1 %v461_v32 }
  0x61   : > { %762 = vmatpush3.msra.mxu1 %v445_v33  ;;  %782 = vmatprep.subr.mxu0 %v997_v60 }
  0x62   : > { %763 = vmatprep.subr.mxu1 %v460_v34 }
  0x63   : > { %738 = vmatmul.mubr.msk.bf16.vlgmr.msra.gmra.mxu0 %vm368_vm1, %v313_v31  ;;  %764 = vmatpush3.msra.mxu1 %v444_v35 }
  0x64   : > { %765 = vmatprep.subr.mxu1 %v459_v36  ;;  %784 = vmatprep.mubr.msk.f32.mxu0 %vm998_vm2, %v997_v60 }
  0x65   : > { %766 = vmatpush3.msra.mxu1 %v443_v37 }
  0x66   : > { %767 = vmatprep.subr.mxu1 %v458_v38 }
  0x67   : > { %768 = vmatpush3.msra.mxu1 %v442_v39 }
  0x68   : > { %769 = vmatprep.subr.mxu1 %v457_v40 }
  0x69   : > { %770 = vmatpush3.msra.mxu1 %v441_v41 }
  0x6a   : > { %771 = vmatprep.subr.mxu1 %v456_v42 }
  0x6b   : > { %772 = vmatpush3.msra.mxu1 %v440_v43 }
  0x6c   : > { %773 = vmatprep.subr.mxu1 %v455_v44 }
  0x6d   : > { %774 = vmatpush3.msra.mxu1 %v439_v45 }
  0x6e   : > { %775 = vmatprep.subr.mxu1 %v454_v46 }
  0x6f   : > { %776 = vmatpush3.msra.mxu1 %v438_v47 }
  0xca   : > { %v424_v48 = vpop.permute.xlu0 %423 }
  0xce   : > { %v432_v52 = vpop.permute.xlu0 %431 }
  0xd9   : > { %v545_v2 = vpop.permute.xlu1 %544 }
 0x123   : > { %v413_v49 = vpop.f32.mrf.mxu0 }
 0x124   : > { %v426_v50 = vmul.f32 %v424_v48, %v413_v49 }
 0x125   : > { %v415_v51 = vpop.f32.mrf.mxu0 }
 0x126   : > { %v427_v53 = vmul.f32 %v424_v48, %v415_v51  ;;  %v434_v54 = vadd.f32 %v432_v52, %v426_v50 }
 0x127   : > { %v417_v55 = vpop.f32.mrf.mxu0 }
 0x128   : > { %v435_v56 = vadd.f32 %v432_v52, %v427_v53  ;;  %v436_v59 = vmax.f32 %v434_v54, 0.0 }
 0x129   : > { %v418_v57 = vpop.f32.mrf.mxu0 }
 0x12a   : > { %v437_v58 = vmax.f32 %v435_v56, 0.0 }
 0x12c   : > { %534 = vmatprep.mubr.f32.mxu1 %v437_v58 }
 0x12d   : > { %535 = vmatmul.mubr.f32.vlgmr.msra.gmra.mxu1 %v436_v59 }
 0x1ed   : > { %v777_v62 = vpop.f32.mrf.mxu1 }
 0x1ef   : > { %v778_v63 = vpop.f32.mrf.mxu1 }
 0x1f0   : > { %v779_v0 = vadd.f32 %v778_v63, %v777_v62 }
 0x1f2   : > { %783 = vmatpush3.msra.mxu0 %v779_v0 }
 0x1f3   : > { %785 = vmatmul.mubr.msk.f32.vlgmr.msra.gmra.mxu0 %vm547_vm3, %v540_v1 }
 0x2b3   : > { %v617_v3 = vpop.f32.mrf.mxu0 }
 0x2b4   : > { %v618_v4 = vadd.f32 %v617_v3, %v545_v2 }
 0x2b5   : > { %v786_v5 = vpop.f32.mrf.mxu0 }
 0x2b6   : > { %vm621_vm4 = vcmp.ge.f32.partialorder %v618_v4, 0.0 }
 0x2b7   : > { %v740_v6 = vsel %vm621_vm4, 1.0, %v997_v60 }
 0x2b8   : > { %624 = vst [vmem:[%s311_s15] sm:$0x3] %v740_v6 }
 0x2b9   : > { %935 = shalt.err (!%p932_p0)
}
 0x2ba   : > { %s936_s14 = scalar_lea.hbm %s1205_s12, 32  ;;  %s940_s4 = scalar_lea.hbm %s1249_s7, 64 }
 0x2bb   : > { %p937_p11 = scmp.ne.s32.totalorder %s1205_s12, %s936_s14  ;;  %p941_p4 = scmp.lt.s32.totalorder %s1205_s12, %s1249_s7 }
 0x2bc   : > { %p942_p6 = scmp.lt.s32.totalorder %s940_s4, %s936_s14 }
 0x2bd   : > { %p938_p2 = pnand %p937_p11, %p1271_p5 }
 0x2be   : > { %p943_p8 = por %p942_p6, %p941_p4 }
 0x2bf   : > { %p939_p1 = pneg %p938_p2 }
 0x2c1   : > { %p944_p3 = pnand %p943_p8, %p939_p1 }
 0x2c3   : > { %947 = shalt.err (!%p944_p3)
}
 0x2c4   : > { %796 = dma.vmem_to_hbm [thread:$0]  (%p1271_p5), %s640_s23, 32, %s1205_s12, %s626_s16  }
 0x2c5 PF: > { %s651_s15 = sand.u32 1, %s978_s24   ;;  %p1272_p7 = scmp.ne.s32.totalorder %s1258_s8, 0 }
 0x2c6   : > { %p1273_p9 = scmp.ge.s32.totalorder %s990_s27, 2  ;;  %s652_s30 = scalar_lea.sflag [#allocation4], %s651_s15 }
 0x2c8   : > { %p807_p10 = pnand %p1273_p9, %p1272_p7 }
 0x2ca   : > { %p808_p12 = pneg %p807_p10 }
 0x2cc   : > { %973 = dma.done.wait (%p808_p12), %s652_s30, 32  }
 0x2cd   : > { %975 = vsyncadd (%p808_p12), %s652_s30, 4294967264  ;;  %p21_p13 = scmp.ge.s32.totalorder %s1094_s13, 4   ;;  %s1274_s24 = smov %s982_s25 }
 0x2ce   : > { %s1275_s25 = smov %s986_s26  ;;  %s1276_s26 = smov %s1114_s21 }
 0x2cf   : > { %s1277_s27 = smov %s1094_s13  ;;  %23 = sbr.rel (!%p21_p13) target bundleno = 8 (0x8), region = 97 }
 0x2d4   :  { %657 = vsyncpa [#allocation3], 1 }
 0x2d5   :  { %659 = vsyncpa [#allocation3 + $0x1], 1 }
 0x2d6   :  { %660 = vsyncpa [#allocation6], 1 }
 0x2d7   :  { %661 = vsyncpa [#allocation4], 1 }
 0x2d8   :  { %663 = vsyncpa [#allocation4 + $0x1], 1 }

</bundles_post_ra>
